<compile_context>
chip_gen: v7x
topology: tpu7x:2x2x1
jax: 0.10.0
libtpu: 0.0.40
codegen_flags: <defaults>
</compile_context>

<pallas_src>
import math

import jax
import jax.numpy as jnp
from jax.experimental import pallas as pl
from jax.experimental.pallas import tpu as pltpu

_LANES = 128  # TPU vreg lane width; keeps the output block lane-dense.


def _sum_stacked2_kernel(x_ref, o_ref):
    # x_ref: (2, TILE_R, 128) VMEM block; reduce the size-2 stack axis with a
    # dense elementwise VPU add. o_ref: (TILE_R, 128) -> unmasked vst.
    o_ref[...] = x_ref[0] + x_ref[1]


def _round_up(v, m):
    return ((v + m - 1) // m) * m


def _sum_stacked2_dense(x2, *, target_rows):
    """x2: (2, m) with m % 128 == 0. Returns (m,) = x2[0] + x2[1]."""
    m = x2.shape[1]
    r_total = m // _LANES
    x3 = x2.reshape(2, r_total, _LANES)

    if r_total <= 8:
        # Full-extent sublane block (allowed even when not a multiple of 8).
        tile_r = r_total
    else:
        # Large rows-per-block (multi-MiB tiles), multiple of 8, but capped so
        # the grid has >= 2 steps (megacore / v7x dual-TC sharding).
        tile_r = min(target_rows, _round_up(pl.cdiv(r_total, 2), 8))

    grid = (pl.cdiv(r_total, tile_r),)

    out3 = pl.pallas_call(
        _sum_stacked2_kernel,
        out_shape=jax.ShapeDtypeStruct((r_total, _LANES), x2.dtype),
        grid_spec=pltpu.PrefetchScalarGridSpec(
            num_scalar_prefetch=0,
            grid=grid,
            in_specs=[pl.BlockSpec((2, tile_r, _LANES), lambda i: (0, i, 0))],
            out_specs=pl.BlockSpec((tile_r, _LANES), lambda i: (i, 0)),
        ),
        compiler_params=pltpu.CompilerParams(
            dimension_semantics=("parallel",),
        ),
    )(x3)
    return out3.reshape(m)


def sum_stacked2(x, *, target_rows=4096):
    """x: array of shape (2, ...). Returns x[0] + x[1] (sum over dim 0)."""
    assert x.shape[0] == 2, "sum_stacked2 requires stack axis of size 2"
    trailing = x.shape[1:]
    m = math.prod(trailing) if trailing else 1

    x2 = x.reshape(2, m)
    rem = m % _LANES
    main = m - rem

    parts = []
    if main:
        x2_main = x2 if rem == 0 else x2[:, :main]
        parts.append(_sum_stacked2_dense(x2_main, target_rows=target_rows))
    if rem:
        # <128-element unaligned tail: tiny plain-XLA add (cheaper than a full
        # extra pad+slice HBM pass over the tensor).
        parts.append(x2[0, main:] + x2[1, main:])

    out = parts[0] if len(parts) == 1 else jnp.concatenate(parts)
    return out.reshape(trailing)


if __name__ == "__main__":
    key = jax.random.PRNGKey(0)
    # Stacked input: stack axis = 2, then a small NCHW tensor.
    x = jax.random.normal(key, (2, 2, 4, 16, 16), dtype=jnp.float32)

    out = jax.block_until_ready(sum_stacked2(x))

    ref = jnp.sum(x, axis=0)
    assert out.shape == ref.shape == (2, 4, 16, 16)
    assert out.dtype == x.dtype
    assert jnp.allclose(out, ref, atol=1e-6, rtol=1e-6)

    print("KERNEL_OK")
</pallas_src>

<mosaic_0001>
module attributes {stable_mosaic.version = 11 : i64} {
  func.func @_sum_stacked2_kernel(%arg0: i32, %arg1: memref<2x8x128xf32, #tpu.memory_space<vmem>>, %arg2: memref<8x128xf32, #tpu.memory_space<vmem>>) attributes {dimension_semantics = [#tpu.dimension_semantics<parallel>], iteration_bounds = array<i64: 2>, scalar_prefetch = 0 : i64, scratch_operands = 0 : i64, tpu.core_type = #tpu.core_type<tc>, window_params = [{transform_indices = @transform_0, window_bounds = array<i64: 2, 8, 128>}, {transform_indices = @transform_1, window_bounds = array<i64: 8, 128>}]} {
    %c0 = arith.constant 0 : index
    %c0_0 = arith.constant 0 : index
    %c0_1 = arith.constant 0 : index
    %0 = vector.load %arg1[%c0, %c0_0, %c0_1] : memref<2x8x128xf32, #tpu.memory_space<vmem>>, vector<1x8x128xf32>
    %1 = vector.shape_cast %0 : vector<1x8x128xf32> to vector<8x128xf32>
    %c1 = arith.constant 1 : index
    %c0_2 = arith.constant 0 : index
    %c0_3 = arith.constant 0 : index
    %2 = vector.load %arg1[%c1, %c0_2, %c0_3] : memref<2x8x128xf32, #tpu.memory_space<vmem>>, vector<1x8x128xf32>
    %3 = vector.shape_cast %2 : vector<1x8x128xf32> to vector<8x128xf32>
    %4 = arith.addf %1, %3 : vector<8x128xf32>
    %c0_4 = arith.constant 0 : index
    %c0_5 = arith.constant 0 : index
    %5 = vector.load %arg2[%c0_4, %c0_5] : memref<8x128xf32, #tpu.memory_space<vmem>>, vector<8x128xf32>
    tpu.vector_store %arg2[%c0_4, %c0_5], %4 {strides = array<i32>} : memref<8x128xf32, #tpu.memory_space<vmem>>, vector<8x128xf32>,
    return
  }
  func.func @transform_0(%arg0: i32) -> (i32, i32, i32) {
    %c0_i32 = arith.constant 0 : i32
    %c0_i32_0 = arith.constant 0 : i32
    %c0_i32_1 = arith.constant 0 : i32
    return %c0_i32, %arg0, %c0_i32_0 : i32, i32, i32
  }
  func.func @transform_1(%arg0: i32) -> (i32, i32) {
    %c0_i32 = arith.constant 0 : i32
    %c0_i32_0 = arith.constant 0 : i32
    return %arg0, %c0_i32 : i32, i32
  }
}

</mosaic_0001>

<bundles_post_ra>
// kernel: tpu_custom_call.1
= control target key start
LH: loop header
LB: loop body
LE: loop exit
PB: predicated region body
PF: predicated region fallthrough
CT: control target
= control target key end

     0   :  { %6 = vsyncpa [#allocation3], 0  ;;  %s561_s0 = inlined_call_operand.hbm [shape: f32[2,16,128], index: 0, kind: input, shape index: {}]   ;;  %s562_s1 = inlined_call_operand.hbm [shape: f32[16,128], index: 1, kind: output, shape index: {}]  }
   0x1   :  { %8 = vsyncpa [#allocation3 + $0x1], 0 }
   0x2   :  { %9 = vsyncpa [#allocation4], 0 }
   0x3   :  { %11 = vsyncpa [#allocation4 + $0x1], 0  ;;  %s398_s6 = smov 0   ;;  %s400_s7 = smov 0  }
   0x4   :  { %s402_s8 = smov 0   ;;  %s404_s9 = smov 0  }
   0x5 LB: > { %s419_s10 = sadd.s32 4294967295, %s381_s9   ;;  %s223_s11 = sadd.s32 4294967294, %s381_s9   ;;  %s381_s9 = sphi %s404_s9, %s576_s9   ;;  %s377_s8 = sphi %s402_s8, %s575_s8   ;;  %s373_s7 = sphi %s400_s7, %s574_s7   ;;  %s369_s6 = sphi %s398_s6, %s573_s6  }
   0x6   : > { %s423_s12 = sadd.s32 1, %s381_s9   ;;  %s24_s13 = sadd.s32 1, %s377_s8 }
   0x7   : > { %s21_s14 = ssub.s32 %s381_s9, %s423_s12  ;;  %p31_p0 = scmp.ne.s32.totalorder %s377_s8, %s373_s7 }
   0x8   : > { %p22_p1 = scmp.eq.s32.totalorder %s21_s14, 0  ;;  %p32_p2 = scmp.eq.s32.totalorder %s381_s9, 0 }
   0x9   : > { %p37_p3 = scmp.ne.s32.totalorder %s373_s7, %s369_s6  ;;  %p38_p4 = scmp.eq.s32.totalorder %s419_s10, 0 }
   0xa   : > { %s435_s15 = scalar_select %p22_p1, %s377_s8, %s24_s13  }
   0xb   : > { %p437_p5 = por %p32_p2, %p31_p0  ;;  %p441_p6 = por %p38_p4, %p37_p3 }
   0xc   : > { %p61_p7 = scmp.eq.s32.totalorder %s419_s10, 1  ;;  %p67_p8 = scmp.eq.s32.totalorder %s223_s11, 1 }
   0xd   : > { %p248_p10 = scmp.lt.s32.totalorder %s381_s9, 2  ;;  %s87_s20 = sand.u32 1, %s377_s8  }
   0xe   : > { %p448_p11 = por %p61_p7, %p31_p0  ;;  %p452_p12 = por %p67_p8, %p37_p3 }
   0xf   : > { %s227_s21 = sshll.u32 %s381_s9, 7  ;;  %s226_s22 = sshll.u32 %s87_s20, 4 }
  0x10   : > { %s566_s18 = scalar_select %p448_p11, 1, 0 }
  0x11   : > { %s567_s19 = scalar_select %p452_p12, 1, 0 }
  0x12   : > { %s461_s25 = scalar_lea.hbm %s561_s0, %s227_s21  ;;  %s91_s26 = scalar_lea.vmem [#allocation2], %s226_s22 }
  0x13   : > { %s97_s27 = sshll.u32 %s91_s26, 4  ;;  %p465_p13 = pnand %p248_p10, %p437_p5  ;;  %s469_s27 = int_to_ptr.vmem [resolvable:$true] %s97_s27 }
  0x14   : > { %s472_s29 = scalar_lea.sflag [#allocation3], %s87_s20  ;;  %s285_s30 = scalar_lea.hbm %s461_s25, 256 }
  0x15   : > { %p286_p1 = scmp.ne.s32.totalorder %s461_s25, %s285_s30  ;;  %p287_p2 = pneg %p465_p13 }
  0x16   : > { %s290_s4 = scalar_lea.hbm %s561_s0, 512  ;;  %p291_p5 = scmp.lt.u32.totalorder %s461_s25, %s561_s0 }
  0x17   : > { %p288_p3 = pnand %p287_p2, %p286_p1  ;;  %p292_p7 = scmp.lt.u32.totalorder %s290_s4, %s285_s30 }
  0x18   : > { %p294_p10 = scmp.lt.u32.totalorder %s285_s30, %s461_s25 }
  0x19   : > { %p289_p4 = pneg %p288_p3  ;;  %p293_p8 = por %p292_p7, %p291_p5 }
  0x1b   : > { %p295_p9 = por %p294_p10, %p293_p8 }
  0x1d   : > { %p296_p0 = pnand %p295_p9, %p289_p4 }
  0x1f   : > { %299 = shalt.err (!%p296_p0)
}
  0x20   : > { %s300_s13 = scalar_lea.vmem %s469_s27, 256  ;;  %s383_s14 = smov [#allocation2]  }
  0x21   : > { %p301_p1 = scmp.ne.s32.totalorder %s469_s27, %s300_s13  ;;  %s305_s16 = sshll.u32 %s383_s14, 4  ;;  %s306_s16 = int_to_ptr.vmem [resolvable:$false] %s305_s16 }
  0x22   : > { %s307_s20 = scalar_lea.vmem %s306_s16, 512  ;;  %p308_p11 = scmp.lt.s32.totalorder %s469_s27, %s306_s16 }
  0x23   : > { %p303_p3 = pnand %p301_p1, %p287_p2  ;;  %p309_p5 = scmp.lt.s32.totalorder %s307_s20, %s300_s13 }
  0x25   : > { %p304_p12 = pneg %p303_p3  ;;  %p310_p7 = por %p309_p5, %p308_p11 }
  0x27   : > { %p311_p8 = pnand %p310_p7, %p304_p12 }
  0x29   : > { %314 = shalt.err (!%p311_p8)
}
  0x2a   : > { %s384_s21 = smov 256   ;;  %s385_s22 = smov 128  }
  0x2b   : > { %s386_s23 = smov 8   ;;  %p105_p9 = scmp.lt.s32.totalorder %s381_s9, 3 }
  0x2c   : > { %243 = dma.hbm_to_vmem [thread:$0]  (!%p465_p13), %s461_s25, 256, %s469_s27, %s472_s29, %s384_s21, %s385_s22, %s386_s23  }
  0x2d   : > { %p569_p0 = scmp.ge.s32.totalorder %s381_s9, 1 }
  0x2f   : > { %p106_p2 = pnand %p569_p0, %p105_p9 }
  0x30   : > { %s504_s24 = sand.u32 (!%p106_p2), 1, %s373_s7  }
  0x31   : > { %109 = sbr.rel (%p106_p2) target bundleno = 83 (0x53), region = 24  ;;  %s229_s26 = sshll.u32 (!%p106_p2), %s504_s24, 4 }
  0x32   : > { %s112_s30 = scalar_lea.sflag (!%p106_p2), [#allocation3], %s504_s24  ;;  %s115_s2 = scalar_lea.vmem (!%p106_p2), [#allocation2], %s229_s26 }
  0x38   : > { %360 = dma.done.wait (%p441_p6), %s112_s30, 256  }
  0x39   : > { %362 = vsyncadd (%p441_p6), %s112_s30, 4294967040  ;;  %s230_s25 = sshll.u32 %s504_s24, 3  ;;  %s233_s29 = sshll.u32 %s419_s10, 7  ;;  %v134_v0 = vld [vmem:[%s115_s2] sm:$0xff]  ;;  %v231_v1 = vld [vmem:[%s115_s2 + $0x8] sm:$0xff] }
  0x3a   : > { %s133_s27 = scalar_lea.vmem [#allocation5], %s230_s25  ;;  %v137_v2 = vadd.f32 %v231_v1, %v134_v0  ;;  %s519_s17 = scalar_lea.hbm %s562_s1, %s233_s29 }
  0x3b   : > { %s153_s28 = sshll.u32 %s133_s27, 4  ;;  %s140_s5 = scalar_lea.sflag [#allocation4], %s504_s24  ;;  %s514_s28 = int_to_ptr.vmem [resolvable:$true] %s153_s28 }
  0x3c   : > { %138 = vst [vmem:[%s133_s27] sm:$0xff] %v137_v2  ;;  %s315_s11 = scalar_lea.vmem %s514_s28, 128  ;;  %p570_p11 = scmp.ne.s32.totalorder %s566_s18, 0 }
  0x3d   : > { %p316_p6 = scmp.ne.s32.totalorder %s514_s28, %s315_s11  ;;  %s387_s10 = smov [#allocation5]  }
  0x3e   : > { %s319_s13 = sshll.u32 %s387_s10, 4  ;;  %s320_s13 = int_to_ptr.vmem [resolvable:$false] %s319_s13 }
  0x3f   : > { %p317_p12 = pnand %p316_p6, %p570_p11  ;;  %s321_s14 = scalar_lea.vmem %s320_s13, 256 }
  0x40   : > { %p322_p4 = scmp.lt.s32.totalorder %s514_s28, %s320_s13  ;;  %p323_p10 = scmp.lt.s32.totalorder %s321_s14, %s315_s11 }
  0x41   : > { %p318_p13 = pneg %p317_p12 }
  0x42   : > { %p324_p1 = por %p323_p10, %p322_p4 }
  0x44   : > { %p325_p3 = pnand %p324_p1, %p318_p13 }
  0x46   : > { %328 = shalt.err (!%p325_p3)
}
  0x47   : > { %s329_s16 = scalar_lea.hbm %s519_s17, 128  ;;  %s333_s22 = scalar_lea.hbm %s562_s1, 256 }
  0x48   : > { %p330_p5 = scmp.ne.s32.totalorder %s519_s17, %s329_s16  ;;  %p334_p9 = scmp.lt.u32.totalorder %s519_s17, %s562_s1 }
  0x49   : > { %p335_p0 = scmp.lt.u32.totalorder %s333_s22, %s329_s16  ;;  %p337_p6 = scmp.lt.u32.totalorder %s329_s16, %s519_s17 }
  0x4a   : > { %p331_p7 = pnand %p330_p5, %p570_p11 }
  0x4b   : > { %p336_p2 = por %p335_p0, %p334_p9 }
  0x4c   : > { %p332_p8 = pneg %p331_p7 }
  0x4d   : > { %p338_p12 = por %p337_p6, %p336_p2 }
  0x4f   : > { %p339_p13 = pnand %p338_p12, %p332_p8 }
  0x51   : > { %342 = shalt.err (!%p339_p13)
}
  0x52   : > { %238 = dma.vmem_to_hbm [thread:$0]  (%p570_p11), %s514_s28, 128, %s519_s17, %s140_s5  }
  0x53 PF: > { %s165_s26 = sand.u32 1, %s369_s6   ;;  %p571_p4 = scmp.ne.s32.totalorder %s567_s19, 0 }
  0x54   : > { %p572_p10 = scmp.ge.s32.totalorder %s381_s9, 2  ;;  %s166_s30 = scalar_lea.sflag [#allocation4], %s165_s26 }
  0x56   : > { %p245_p1 = pnand %p572_p10, %p571_p4 }
  0x58   : > { %364 = dma.done.wait (!%p245_p1), %s166_s30, 128  }
  0x59   : > { %366 = vsyncadd (!%p245_p1), %s166_s30, 4294967168  ;;  %p14_p3 = scmp.ge.s32.totalorder %s423_s12, 4   ;;  %s573_s6 = smov %s373_s7 }
  0x5a   : > { %s574_s7 = smov %s377_s8  ;;  %s575_s8 = smov %s435_s15 }
  0x5b   : > { %s576_s9 = smov %s423_s12  ;;  %16 = sbr.rel (!%p14_p3) target bundleno = 5 (0x5), region = 70 }
  0x62   :  { %171 = vsyncpa [#allocation3], 1 }
  0x63   :  { %173 = vsyncpa [#allocation3 + $0x1], 1 }
  0x64   :  { %174 = vsyncpa [#allocation4], 1 }
  0x65   :  { %176 = vsyncpa [#allocation4 + $0x1], 1 }

</bundles_post_ra>
